<compile_context>
chip_gen: v7x
topology: tpu7x:2x2x1
jax: 0.10.0
libtpu: 0.0.40
codegen_flags: <defaults>
</compile_context>

<pallas_src>
import jax
import jax.numpy as jnp
import numpy as np
from jax.experimental import pallas as pl
from jax.experimental.pallas import tpu as pltpu

BN_EPS = 1e-5


def _laurel_kernel(pt_ref, wbig_ref, gamma_ref, beta_ref, out_ref):
    """Whole forward pass in one grid step.

    pt_ref   : (9*C, B*H*W)  im2col patches, rows ordered (k, c_in), k=ky*3+kx
    wbig_ref : (2*C, 9*C)    rows [0,C): conv weight (columns ordered (k,c_in));
                             rows [C,2C): zeros except centre-tap block = A@B + I
    gamma_ref: (C, 1)        BN scale
    beta_ref : (C, 1)        BN shift
    out_ref  : (B, C, H*W)
    """
    Bsz, C, HW = out_ref.shape
    n_pix = Bsz * HW

    # ONE im2col matmul on the MXU (M=2C, K=9*C, N=B*H*W):
    #   rows [0,C)  -> conv output f
    #   rows [C,2C) -> (A@B + I) @ x   (centre-tap block of pt IS x)
    big = jnp.dot(wbig_ref[...], pt_ref[...],
                  preferred_element_type=jnp.float32)          # (2C, n_pix)
    f = big[:C, :]
    res = big[C:, :]

    # Train-mode BatchNorm, one-pass stats over the lane (N*H*W) axis,
    # biased variance (matches PyTorch).  Note: E[x^2]-mean^2 has a
    # cancellation risk when |mean| >> std; acceptable here.
    inv_n = jnp.float32(1.0 / n_pix)
    s1 = jnp.sum(f, axis=1, keepdims=True)                      # (C, 1)
    s2 = jnp.sum(f * f, axis=1, keepdims=True)                  # (C, 1)
    mean = s1 * inv_n
    var = s2 * inv_n - mean * mean
    scale = gamma_ref[...] * jax.lax.rsqrt(var + BN_EPS)        # (C, 1)
    shift = beta_ref[...] - mean * scale                        # (C, 1)

    # Single fused scale/shift + ReLU pass over f, then add the residual.
    y = jnp.maximum(f * scale + shift, 0.0) + res               # (C, n_pix)

    # Lane-dense stores: one (C, H*W) slab per batch element (H*W = 256,
    # so each column slice is lane-tile aligned).
    for b in range(Bsz):
        out_ref[b] = y[:, b * HW:(b + 1) * HW]


@jax.jit
def laurel_lr_block(x_nchw, conv_w, gamma, beta, A, Bm):
    """x_nchw: (N, C, H, W). conv_w: (Cout, Cin, 3, 3). Returns (N, C, H, W)."""
    Bsz, C, H, W = x_nchw.shape
    Cout = conv_w.shape[0]
    assert Cout == C, "LAuReL-LR residual requires out_channels == in_channels"
    HW = H * W
    n_pix = Bsz * HW

    # ---- layout prep ----
    # Transpose BEFORE the 9x inflation: the C<->B shuffle now touches the
    # 64 KiB x instead of the 576 KiB patch matrix; everything after the
    # stack is a contiguous reshape (no materializing transpose).
    xt = jnp.transpose(x_nchw, (1, 0, 2, 3))                    # (C, B, H, W)
    xpad = jnp.pad(xt, ((0, 0), (0, 0), (1, 1), (1, 1)))        # (C, B, H+2, W+2)
    taps = [xpad[:, :, dy:dy + H, dx:dx + W]                    # (C, B, H, W) each
            for dy in range(3) for dx in range(3)]
    pt = jnp.stack(taps, axis=0)                                # (9, C, B, H, W)
    pt = pt.reshape(9 * C, n_pix).astype(jnp.float32)           # (9C, B*H*W)

    # w2[cout, k*C + cin] = conv_w[cout, cin, ky, kx],  k = ky*3 + kx
    w2 = jnp.transpose(conv_w, (0, 2, 3, 1)).reshape(Cout, 9 * C)
    w2 = w2.astype(jnp.float32)

    # Fold low-rank residual + identity skip into the same matmul:
    # W_big rows [C,2C) are zero except the centre-tap (k=4) column block.
    m_res = (A @ Bm).astype(jnp.float32) + jnp.eye(C, dtype=jnp.float32)
    w_big = jnp.zeros((2 * C, 9 * C), jnp.float32)
    w_big = w_big.at[:C, :].set(w2)
    w_big = w_big.at[C:, 4 * C:5 * C].set(m_res)

    gamma_c = gamma.reshape(C, 1).astype(jnp.float32)
    beta_c = beta.reshape(C, 1).astype(jnp.float32)

    # Everything lives whole-array in VMEM; guard the footprint so scaling
    # the shapes fails loudly instead of blowing the scoped-VMEM limit.
    vmem_bytes = 4 * (pt.size + w_big.size + 2 * C + Bsz * C * HW)
    assert vmem_bytes < 16 * 1024 * 1024, (
        "activations no longer fit VMEM; add a pixel-tile grid")
    # TODO(synk): when B*H*W scales up, add a pixel-tile grid axis with
    # dimension_semantics=('parallel',) (uses v7x's 2 TCs) and a two-pass BN
    # (stats pass + normalize pass).  Budget the tile against v7x's 64 MiB
    # physical / 32 MiB scoped VMEM and remember BlockSpec double-buffers
    # each input (2x pt tile + 2x output tile).

    vmem = pl.BlockSpec(memory_space=pltpu.MemorySpace.VMEM)
    out = pl.pallas_call(
        _laurel_kernel,
        out_shape=jax.ShapeDtypeStruct((Bsz, C, HW), jnp.float32),
        in_specs=[vmem] * 4,
        out_specs=vmem,
    )(pt, w_big, gamma_c, beta_c)

    return out.reshape(Bsz, C, H, W)                            # free reshape to NCHW


def _reference(x, conv_w, gamma, beta, A, Bm):
    """Pure-JAX replica of the PyTorch forward (train-mode BN)."""
    f = jax.lax.conv_general_dilated(
        x, conv_w, window_strides=(1, 1), padding=((1, 1), (1, 1)),
        dimension_numbers=("NCHW", "OIHW", "NCHW"))
    mean = f.mean(axis=(0, 2, 3), keepdims=True)
    var = ((f - mean) ** 2).mean(axis=(0, 2, 3), keepdims=True)
    f = (f - mean) * jax.lax.rsqrt(var + BN_EPS)
    f = f * gamma.reshape(1, -1, 1, 1) + beta.reshape(1, -1, 1, 1)
    f = jnp.maximum(f, 0.0)
    Bsz, C, H, W = x.shape
    x_flat = x.reshape(Bsz, C, H * W)
    abx = jnp.einsum("cr,rk,bkp->bcp", A, Bm, x_flat).reshape(x.shape)
    return f + abx + x


if __name__ == "__main__":
    # Small shapes implied by the module: N=2, C_in=C_out=32, H=W=16, rank=16.
    Bsz, C, H, W, rank = 2, 32, 16, 16, 16

    key = jax.random.PRNGKey(0)
    k_x, k_w, k_g, k_b, k_A, k_B = jax.random.split(key, 6)

    x = jax.random.normal(k_x, (Bsz, C, H, W), jnp.float32)
    conv_w = jax.random.normal(k_w, (C, C, 3, 3), jnp.float32) * 0.1
    gamma = 1.0 + 0.1 * jax.random.normal(k_g, (C,), jnp.float32)
    beta = 0.1 * jax.random.normal(k_b, (C,), jnp.float32)
    A = jax.random.normal(k_A, (C, rank), jnp.float32) * 0.3
    Bm = jax.random.normal(k_B, (rank, C), jnp.float32) * 0.3

    out = laurel_lr_block(x, conv_w, gamma, beta, A, Bm)
    out = jax.block_until_ready(out)

    ref = jax.block_until_ready(_reference(x, conv_w, gamma, beta, A, Bm))
    np.testing.assert_allclose(np.asarray(out), np.asarray(ref),
                               rtol=2e-3, atol=2e-3)

    print("KERNEL_OK")
</pallas_src>

<mosaic_0001>
module attributes {stable_mosaic.version = 11 : i64} {
  func.func @_laurel_kernel(%arg0: memref<288x512xf32, #tpu.memory_space<vmem>>, %arg1: memref<64x288xf32, #tpu.memory_space<vmem>>, %arg2: memref<32x1xf32, #tpu.memory_space<vmem>>, %arg3: memref<32x1xf32, #tpu.memory_space<vmem>>, %arg4: memref<2x32x256xf32, #tpu.memory_space<vmem>>) attributes {dimension_semantics = [], scalar_prefetch = 0 : i64, scratch_operands = 0 : i64, tpu.core_type = #tpu.core_type<tc>} {
    %c0 = arith.constant 0 : index
    %c0_0 = arith.constant 0 : index
    %0 = vector.load %arg1[%c0, %c0_0] : memref<64x288xf32, #tpu.memory_space<vmem>>, vector<64x288xf32>
    %c0_1 = arith.constant 0 : index
    %c0_2 = arith.constant 0 : index
    %1 = vector.load %arg0[%c0_1, %c0_2] : memref<288x512xf32, #tpu.memory_space<vmem>>, vector<288x512xf32>
    %cst = arith.constant dense<0.000000e+00> : vector<64x512xf32>
    %2 = tpu.matmul %0, %1, %cst {dimension_numbers = #tpu.dot_dimension_numbers<[1], [0], [0], [1], [0, 0, 1, 1], [], []>} : vector<64x288xf32>, vector<288x512xf32>, vector<64x512xf32> -> vector<64x512xf32>
    %3 = vector.extract_strided_slice %2 {offsets = [0, 0], sizes = [32, 512], strides = [1, 1]} : vector<64x512xf32> to vector<32x512xf32>
    %4 = vector.extract_strided_slice %2 {offsets = [32, 0], sizes = [32, 512], strides = [1, 1]} : vector<64x512xf32> to vector<32x512xf32>
    %cst_3 = arith.constant dense<0.000000e+00> : vector<32xf32>
    %5 = vector.multi_reduction <add>, %3, %cst_3 [1] : vector<32x512xf32> to vector<32xf32>
    %6 = vector.shape_cast %5 : vector<32xf32> to vector<32x1xf32>
    %7 = arith.mulf %3, %3 : vector<32x512xf32>
    %cst_4 = arith.constant dense<0.000000e+00> : vector<32xf32>
    %8 = vector.multi_reduction <add>, %7, %cst_4 [1] : vector<32x512xf32> to vector<32xf32>
    %9 = vector.shape_cast %8 : vector<32xf32> to vector<32x1xf32>
    %cst_5 = arith.constant 0.001953125 : f32
    %10 = vector.broadcast %cst_5 : f32 to vector<32x1xf32>
    %11 = arith.mulf %6, %10 : vector<32x1xf32>
    %cst_6 = arith.constant 0.001953125 : f32
    %12 = vector.broadcast %cst_6 : f32 to vector<32x1xf32>
    %13 = arith.mulf %9, %12 : vector<32x1xf32>
    %14 = arith.mulf %11, %11 : vector<32x1xf32>
    %15 = arith.subf %13, %14 : vector<32x1xf32>
    %c0_7 = arith.constant 0 : index
    %c0_8 = arith.constant 0 : index
    %16 = vector.load %arg2[%c0_7, %c0_8] : memref<32x1xf32, #tpu.memory_space<vmem>>, vector<32x1xf32>
    %cst_9 = arith.constant 9.99999974E-6 : f32
    %17 = vector.broadcast %cst_9 : f32 to vector<32x1xf32>
    %18 = arith.addf %15, %17 : vector<32x1xf32>
    %19 = math.rsqrt %18 : vector<32x1xf32>
    %20 = arith.mulf %16, %19 : vector<32x1xf32>
    %c0_10 = arith.constant 0 : index
    %c0_11 = arith.constant 0 : index
    %21 = vector.load %arg3[%c0_10, %c0_11] : memref<32x1xf32, #tpu.memory_space<vmem>>, vector<32x1xf32>
    %22 = arith.mulf %11, %20 : vector<32x1xf32>
    %23 = arith.subf %21, %22 : vector<32x1xf32>
    %24 = vector.broadcast %20 : vector<32x1xf32> to vector<32x512xf32>
    %25 = arith.mulf %3, %24 : vector<32x512xf32>
    %26 = vector.broadcast %23 : vector<32x1xf32> to vector<32x512xf32>
    %27 = arith.addf %25, %26 : vector<32x512xf32>
    %cst_12 = arith.constant 0.000000e+00 : f32
    %28 = vector.broadcast %cst_12 : f32 to vector<32x512xf32>
    %29 = arith.maximumf %27, %28 : vector<32x512xf32>
    %30 = arith.addf %29, %4 : vector<32x512xf32>
    %31 = vector.extract_strided_slice %30 {offsets = [0, 0], sizes = [32, 256], strides = [1, 1]} : vector<32x512xf32> to vector<32x256xf32>
    %c0_13 = arith.constant 0 : index
    %c0_14 = arith.constant 0 : index
    %c0_15 = arith.constant 0 : index
    %32 = vector.load %arg4[%c0_13, %c0_14, %c0_15] : memref<2x32x256xf32, #tpu.memory_space<vmem>>, vector<1x32x256xf32>
    %33 = vector.shape_cast %32 : vector<1x32x256xf32> to vector<32x256xf32>
    %34 = vector.shape_cast %31 : vector<32x256xf32> to vector<1x32x256xf32>
    tpu.vector_store %arg4[%c0_13, %c0_14, %c0_15], %34 {strides = array<i32>} : memref<2x32x256xf32, #tpu.memory_space<vmem>>, vector<1x32x256xf32>,
    %35 = vector.extract_strided_slice %30 {offsets = [0, 256], sizes = [32, 256], strides = [1, 1]} : vector<32x512xf32> to vector<32x256xf32>
    %c1 = arith.constant 1 : index
    %c0_16 = arith.constant 0 : index
    %c0_17 = arith.constant 0 : index
    %36 = vector.load %arg4[%c1, %c0_16, %c0_17] : memref<2x32x256xf32, #tpu.memory_space<vmem>>, vector<1x32x256xf32>
    %37 = vector.shape_cast %36 : vector<1x32x256xf32> to vector<32x256xf32>
    %38 = vector.shape_cast %35 : vector<32x256xf32> to vector<1x32x256xf32>
    tpu.vector_store %arg4[%c1, %c0_16, %c0_17], %38 {strides = array<i32>} : memref<2x32x256xf32, #tpu.memory_space<vmem>>, vector<1x32x256xf32>,
    return
  }
}

</mosaic_0001>

<bundles_post_ra>
// kernel: laurel_lr_block.1
= control target key start
LH: loop header
LB: loop body
LE: loop exit
PB: predicated region body
PF: predicated region fallthrough
CT: control target
= control target key end

     0   :  { %vm185_vm0 = vcmask 261120   ;;  %s1862_s0 = inlined_call_operand.vmem [shape: f32[288,512], index: 0, kind: input, shape index: {}]   ;;  %s1863_s1 = inlined_call_operand.vmem [shape: f32[64,288], index: 1, kind: input, shape index: {}]   ;;  %s1864_s2 = inlined_call_operand.vmem [shape: f32[32,1], index: 2, kind: input, shape index: {}]   ;;  %s1865_s3 = inlined_call_operand.vmem [shape: f32[32,1], index: 3, kind: input, shape index: {}]   ;;  %s1866_s4 = inlined_call_operand.vmem [shape: f32[2,32,256], index: 4, kind: output, shape index: {}]  }
   0x1   :  { %v42_v0 = vld [vmem:[%s1862_s0 + $0x8] sm:$0xff]  ;;  %v44_v2 = vld [vmem:[%s1862_s0 + $0x18] sm:$0xff]  ;;  %v41_v5 = vld [vmem:[%s1862_s0] sm:$0xff] }
   0x2   :  { %v46_v1 = vld [vmem:[%s1862_s0 + $0x28] sm:$0xff]  ;;  %v48_v4 = vld [vmem:[%s1862_s0 + $0x38] sm:$0xff]  ;;  %v45_v6 = vld [vmem:[%s1862_s0 + $0x20] sm:$0xff] }
   0x3   :  { %v911_v3 = vpack.c.bf16 %v46_v1, %v42_v0  ;;  %v983_v7 = vpack.c.bf16 %v48_v4, %v44_v2  ;;  %v913_v8 = vpack.c.bf16 %v45_v6, %v41_v5  ;;  %v43_v9 = vld [vmem:[%s1862_s0 + $0x10] sm:$0xff]  ;;  %v50_v11 = vld [vmem:[%s1862_s0 + $0x48] sm:$0xff]  ;;  %v52_v14 = vld [vmem:[%s1862_s0 + $0x58] sm:$0xff] }
   0x4   :  { %v47_v10 = vld [vmem:[%s1862_s0 + $0x30] sm:$0xff]  ;;  %v54_v13 = vld [vmem:[%s1862_s0 + $0x68] sm:$0xff]  ;;  %v56_v15 = vld [vmem:[%s1862_s0 + $0x78] sm:$0xff] }
   0x5   :  { %912 = vmatprep.subr.bf16.mxu0 %v911_v3  ;;  %v985_v12 = vpack.c.bf16 %v47_v10, %v43_v9  ;;  %984 = vmatprep.subr.bf16.mxu1 %v983_v7  ;;  %v915_v16 = vpack.c.bf16 %v54_v13, %v50_v11  ;;  %v987_v17 = vpack.c.bf16 %v56_v15, %v52_v14  ;;  %v49_v18 = vld [vmem:[%s1862_s0 + $0x40] sm:$0xff]  ;;  %v51_v20 = vld [vmem:[%s1862_s0 + $0x50] sm:$0xff]  ;;  %v58_v23 = vld [vmem:[%s1862_s0 + $0x88] sm:$0xff] }
   0x6   :  { %914 = vmatpush1.bf16.msra.mxu0 %v913_v8  ;;  %v53_v19 = vld [vmem:[%s1862_s0 + $0x60] sm:$0xff]  ;;  %v55_v22 = vld [vmem:[%s1862_s0 + $0x70] sm:$0xff]  ;;  %v62_v24 = vld [vmem:[%s1862_s0 + $0xa8] sm:$0xff] }
   0x7   :  { %986 = vmatpush1.bf16.msra.mxu1 %v985_v12  ;;  %v917_v21 = vpack.c.bf16 %v53_v19, %v49_v18  ;;  %916 = vmatprep.subr.bf16.mxu0 %v915_v16  ;;  %v989_v25 = vpack.c.bf16 %v55_v22, %v51_v20  ;;  %v919_v26 = vpack.c.bf16 %v62_v24, %v58_v23  ;;  %v60_v27 = vld [vmem:[%s1862_s0 + $0x98] sm:$0xff]  ;;  %v57_v29 = vld [vmem:[%s1862_s0 + $0x80] sm:$0xff]  ;;  %v59_v32 = vld [vmem:[%s1862_s0 + $0x90] sm:$0xff] }
   0x8   :  { %988 = vmatprep.subr.bf16.mxu1 %v987_v17  ;;  %v64_v28 = vld [vmem:[%s1862_s0 + $0xb8] sm:$0xff]  ;;  %v61_v31 = vld [vmem:[%s1862_s0 + $0xa0] sm:$0xff]  ;;  %v63_v33 = vld [vmem:[%s1862_s0 + $0xb0] sm:$0xff] }
   0x9   :  { %v991_v30 = vpack.c.bf16 %v64_v28, %v60_v27  ;;  %v921_v34 = vpack.c.bf16 %v61_v31, %v57_v29  ;;  %v66_v35 = vld [vmem:[%s1862_s0 + $0xc8] sm:$0xff]  ;;  %v68_v37 = vld [vmem:[%s1862_s0 + $0xd8] sm:$0xff]  ;;  %v993_v38 = vpack.c.bf16 %v63_v33, %v59_v32  ;;  %v65_v41 = vld [vmem:[%s1862_s0 + $0xc0] sm:$0xff] }
   0xa   :  { %918 = vmatpush1.bf16.msra.mxu0 %v917_v21  ;;  %v70_v36 = vld [vmem:[%s1862_s0 + $0xe8] sm:$0xff]  ;;  %v72_v40 = vld [vmem:[%s1862_s0 + $0xf8] sm:$0xff]  ;;  %v69_v42 = vld [vmem:[%s1862_s0 + $0xe0] sm:$0xff] }
   0xb   :  { %990 = vmatpush1.bf16.msra.mxu1 %v989_v25  ;;  %920 = vmatprep.subr.bf16.mxu0 %v919_v26  ;;  %v923_v39 = vpack.c.bf16 %v70_v36, %v66_v35  ;;  %v995_v43 = vpack.c.bf16 %v72_v40, %v68_v37  ;;  %v67_v44 = vld [vmem:[%s1862_s0 + $0xd0] sm:$0xff]  ;;  %v74_v46 = vld [vmem:[%s1862_s0 + $0x108] sm:$0xff]  ;;  %v76_v48 = vld [vmem:[%s1862_s0 + $0x118] sm:$0xff]  ;;  %v925_v50 = vpack.c.bf16 %v69_v42, %v65_v41 }
   0xc   :  { %992 = vmatprep.subr.bf16.mxu1 %v991_v30  ;;  %v71_v45 = vld [vmem:[%s1862_s0 + $0xf0] sm:$0xff]  ;;  %v78_v47 = vld [vmem:[%s1862_s0 + $0x128] sm:$0xff]  ;;  %v80_v49 = vld [vmem:[%s1862_s0 + $0x138] sm:$0xff] }
   0xd   :  { %v997_v51 = vpack.c.bf16 %v71_v45, %v67_v44  ;;  %v927_v52 = vpack.c.bf16 %v78_v47, %v74_v46  ;;  %v73_v53 = vld [vmem:[%s1862_s0 + $0x100] sm:$0xff]  ;;  %v75_v55 = vld [vmem:[%s1862_s0 + $0x110] sm:$0xff]  ;;  %v999_v56 = vpack.c.bf16 %v80_v49, %v76_v48  ;;  %v82_v58 = vld [vmem:[%s1862_s0 + $0x148] sm:$0xff] }
   0xe   :  { %922 = vmatpush1.bf16.msra.mxu0 %v921_v34  ;;  %v77_v54 = vld [vmem:[%s1862_s0 + $0x120] sm:$0xff]  ;;  %v79_v57 = vld [vmem:[%s1862_s0 + $0x130] sm:$0xff]  ;;  %v86_v59 = vld [vmem:[%s1862_s0 + $0x168] sm:$0xff] }
   0xf   :  { %994 = vmatpush1.bf16.msra.mxu1 %v993_v38  ;;  %924 = vmatprep.subr.bf16.mxu0 %v923_v39  ;;  %v84_v60 = vld [vmem:[%s1862_s0 + $0x158] sm:$0xff]  ;;  %v929_v62 = vpack.c.bf16 %v77_v54, %v73_v53  ;;  %v1001_v63 = vpack.c.bf16 %v79_v57, %v75_v55  ;;  %v931_v0 = vpack.c.bf16 %v86_v59, %v82_v58  ;;  %v81_v1 = vld [vmem:[%s1862_s0 + $0x140] sm:$0xff]  ;;  %v83_v3 = vld [vmem:[%s1862_s0 + $0x150] sm:$0xff] }
  0x10   :  { %996 = vmatprep.subr.bf16.mxu1 %v995_v43  ;;  %v88_v61 = vld [vmem:[%s1862_s0 + $0x178] sm:$0xff]  ;;  %v85_v2 = vld [vmem:[%s1862_s0 + $0x160] sm:$0xff]  ;;  %v87_v5 = vld [vmem:[%s1862_s0 + $0x170] sm:$0xff] }
  0x11   :  { %v1003_v4 = vpack.c.bf16 %v88_v61, %v84_v60  ;;  %v90_v6 = vld [vmem:[%s1862_s0 + $0x188] sm:$0xff]  ;;  %v92_v8 = vld [vmem:[%s1862_s0 + $0x198] sm:$0xff]  ;;  %v933_v10 = vpack.c.bf16 %v85_v2, %v81_v1  ;;  %v1005_v11 = vpack.c.bf16 %v87_v5, %v83_v3  ;;  %v89_v13 = vld [vmem:[%s1862_s0 + $0x180] sm:$0xff] }
  0x12   :  { %926 = vmatpush1.bf16.msra.mxu0 %v925_v50  ;;  %v94_v7 = vld [vmem:[%s1862_s0 + $0x1a8] sm:$0xff]  ;;  %v96_v9 = vld [vmem:[%s1862_s0 + $0x1b8] sm:$0xff]  ;;  %v93_v14 = vld [vmem:[%s1862_s0 + $0x1a0] sm:$0xff] }
  0x13   :  { %998 = vmatpush1.bf16.msra.mxu1 %v997_v51  ;;  %928 = vmatprep.subr.bf16.mxu0 %v927_v52  ;;  %v935_v12 = vpack.c.bf16 %v94_v7, %v90_v6  ;;  %v91_v15 = vld [vmem:[%s1862_s0 + $0x190] sm:$0xff]  ;;  %v1007_v16 = vpack.c.bf16 %v96_v9, %v92_v8  ;;  %v98_v18 = vld [vmem:[%s1862_s0 + $0x1c8] sm:$0xff]  ;;  %v100_v20 = vld [vmem:[%s1862_s0 + $0x1d8] sm:$0xff]  ;;  %v937_v22 = vpack.c.bf16 %v93_v14, %v89_v13 }
  0x14   :  { %1000 = vmatprep.subr.bf16.mxu1 %v999_v56  ;;  %v95_v17 = vld [vmem:[%s1862_s0 + $0x1b0] sm:$0xff]  ;;  %v102_v19 = vld [vmem:[%s1862_s0 + $0x1e8] sm:$0xff]  ;;  %v104_v21 = vld [vmem:[%s1862_s0 + $0x1f8] sm:$0xff] }
  0x15   :  { %v1009_v23 = vpack.c.bf16 %v95_v17, %v91_v15  ;;  %v939_v24 = vpack.c.bf16 %v102_v19, %v98_v18  ;;  %v97_v25 = vld [vmem:[%s1862_s0 + $0x1c0] sm:$0xff]  ;;  %v99_v27 = vld [vmem:[%s1862_s0 + $0x1d0] sm:$0xff]  ;;  %v1011_v28 = vpack.c.bf16 %v104_v21, %v100_v20  ;;  %v106_v30 = vld [vmem:[%s1862_s0 + $0x208] sm:$0xff] }
  0x16   :  { %930 = vmatpush1.bf16.msra.mxu0 %v929_v62  ;;  %v101_v26 = vld [vmem:[%s1862_s0 + $0x1e0] sm:$0xff]  ;;  %v103_v29 = vld [vmem:[%s1862_s0 + $0x1f0] sm:$0xff]  ;;  %v110_v31 = vld [vmem:[%s1862_s0 + $0x228] sm:$0xff] }
  0x17   :  { %1002 = vmatpush1.bf16.msra.mxu1 %v1001_v63  ;;  %932 = vmatprep.subr.bf16.mxu0 %v931_v0  ;;  %v108_v32 = vld [vmem:[%s1862_s0 + $0x218] sm:$0xff]  ;;  %v941_v34 = vpack.c.bf16 %v101_v26, %v97_v25  ;;  %v1013_v35 = vpack.c.bf16 %v103_v29, %v99_v27  ;;  %v943_v36 = vpack.c.bf16 %v110_v31, %v106_v30  ;;  %v105_v37 = vld [vmem:[%s1862_s0 + $0x200] sm:$0xff]  ;;  %v107_v39 = vld [vmem:[%s1862_s0 + $0x210] sm:$0xff] }
  0x18   :  { %1004 = vmatprep.subr.bf16.mxu1 %v1003_v4  ;;  %v112_v33 = vld [vmem:[%s1862_s0 + $0x238] sm:$0xff]  ;;  %v109_v38 = vld [vmem:[%s1862_s0 + $0x220] sm:$0xff]  ;;  %v111_v41 = vld [vmem:[%s1862_s0 + $0x230] sm:$0xff] }
  0x19   :  { %v1015_v40 = vpack.c.bf16 %v112_v33, %v108_v32  ;;  %v114_v42 = vld [vmem:[%s1862_s0 + $0x248] sm:$0xff]  ;;  %v116_v44 = vld [vmem:[%s1862_s0 + $0x258] sm:$0xff]  ;;  %v945_v46 = vpack.c.bf16 %v109_v38, %v105_v37  ;;  %v1017_v47 = vpack.c.bf16 %v111_v41, %v107_v39  ;;  %v113_v49 = vld [vmem:[%s1862_s0 + $0x240] sm:$0xff] }
  0x1a   :  { %934 = vmatpush1.bf16.msra.mxu0 %v933_v10  ;;  %v118_v43 = vld [vmem:[%s1862_s0 + $0x268] sm:$0xff]  ;;  %v120_v45 = vld [vmem:[%s1862_s0 + $0x278] sm:$0xff]  ;;  %v117_v50 = vld [vmem:[%s1862_s0 + $0x260] sm:$0xff] }
  0x1b   :  { %1006 = vmatpush1.bf16.msra.mxu1 %v1005_v11  ;;  %936 = vmatprep.subr.bf16.mxu0 %v935_v12  ;;  %v947_v48 = vpack.c.bf16 %v118_v43, %v114_v42  ;;  %v115_v51 = vld [vmem:[%s1862_s0 + $0x250] sm:$0xff]  ;;  %v1019_v52 = vpack.c.bf16 %v120_v45, %v116_v44  ;;  %v122_v54 = vld [vmem:[%s1862_s0 + $0x288] sm:$0xff]  ;;  %v124_v56 = vld [vmem:[%s1862_s0 + $0x298] sm:$0xff]  ;;  %v949_v58 = vpack.c.bf16 %v117_v50, %v113_v49 }
  0x1c   :  { %1008 = vmatprep.subr.bf16.mxu1 %v1007_v16  ;;  %v119_v53 = vld [vmem:[%s1862_s0 + $0x270] sm:$0xff]  ;;  %v126_v55 = vld [vmem:[%s1862_s0 + $0x2a8] sm:$0xff]  ;;  %v128_v57 = vld [vmem:[%s1862_s0 + $0x2b8] sm:$0xff] }
  0x1d   :  { %v1021_v59 = vpack.c.bf16 %v119_v53, %v115_v51  ;;  %v951_v60 = vpack.c.bf16 %v126_v55, %v122_v54  ;;  %v121_v61 = vld [vmem:[%s1862_s0 + $0x280] sm:$0xff]  ;;  %v123_v63 = vld [vmem:[%s1862_s0 + $0x290] sm:$0xff]  ;;  %v1023_v0 = vpack.c.bf16 %v128_v57, %v124_v56  ;;  %v130_v2 = vld [vmem:[%s1862_s0 + $0x2c8] sm:$0xff] }
  0x1e   :  { %938 = vmatpush1.bf16.msra.mxu0 %v937_v22  ;;  %v125_v62 = vld [vmem:[%s1862_s0 + $0x2a0] sm:$0xff]  ;;  %v127_v1 = vld [vmem:[%s1862_s0 + $0x2b0] sm:$0xff]  ;;  %v134_v3 = vld [vmem:[%s1862_s0 + $0x2e8] sm:$0xff] }
  0x1f   :  { %1010 = vmatpush1.bf16.msra.mxu1 %v1009_v23  ;;  %940 = vmatprep.subr.bf16.mxu0 %v939_v24  ;;  %v132_v4 = vld [vmem:[%s1862_s0 + $0x2d8] sm:$0xff]  ;;  %v953_v6 = vpack.c.bf16 %v125_v62, %v121_v61  ;;  %v129_v7 = vld [vmem:[%s1862_s0 + $0x2c0] sm:$0xff]  ;;  %v1025_v8 = vpack.c.bf16 %v127_v1, %v123_v63  ;;  %v955_v9 = vpack.c.bf16 %v134_v3, %v130_v2  ;;  %v131_v11 = vld [vmem:[%s1862_s0 + $0x2d0] sm:$0xff] }
  0x20   :  { %1012 = vmatprep.subr.bf16.mxu1 %v1011_v28  ;;  %v136_v5 = vld [vmem:[%s1862_s0 + $0x2f8] sm:$0xff]  ;;  %v133_v10 = vld [vmem:[%s1862_s0 + $0x2e0] sm:$0xff]  ;;  %v135_v12 = vld [vmem:[%s1862_s0 + $0x2f0] sm:$0xff] }
  0x21   :  { %v1027_v13 = vpack.c.bf16 %v136_v5, %v132_v4  ;;  %v138_v14 = vld [vmem:[%s1862_s0 + $0x308] sm:$0xff]  ;;  %v140_v17 = vld [vmem:[%s1862_s0 + $0x318] sm:$0xff]  ;;  %v957_v19 = vpack.c.bf16 %v133_v10, %v129_v7  ;;  %v1029_v20 = vpack.c.bf16 %v135_v12, %v131_v11  ;;  %v137_v22 = vld [vmem:[%s1862_s0 + $0x300] sm:$0xff] }
  0x22   :  { %942 = vmatpush1.bf16.msra.mxu0 %v941_v34  ;;  %v142_v15 = vld [vmem:[%s1862_s0 + $0x328] sm:$0xff]  ;;  %v144_v18 = vld [vmem:[%s1862_s0 + $0x338] sm:$0xff]  ;;  %v141_v23 = vld [vmem:[%s1862_s0 + $0x320] sm:$0xff] }
  0x23   :  { %1014 = vmatpush1.bf16.msra.mxu1 %v1013_v35  ;;  %944 = vmatprep.subr.bf16.mxu0 %v943_v36  ;;  %v18_v16 = vld [vmem:[%s1863_s1 + $0x8] sm:$0xff]  ;;  %v959_v21 = vpack.c.bf16 %v142_v15, %v138_v14  ;;  %v139_v24 = vld [vmem:[%s1862_s0 + $0x310] sm:$0xff]  ;;  %v1031_v25 = vpack.c.bf16 %v144_v18, %v140_v17  ;;  %v148_v29 = vld [vmem:[%s1862_s0 + $0x358] sm:$0xff]  ;;  %v961_v31 = vpack.c.bf16 %v141_v23, %v137_v22 }
  0x24   :  { %1016 = vmatprep.subr.bf16.mxu1 %v1015_v40  ;;  %274 = vmatprep.mubr.f32.mxu0 %v18_v16  ;;  %v143_v26 = vld [vmem:[%s1862_s0 + $0x330] sm:$0xff]  ;;  %v146_v27 = vld [vmem:[%s1862_s0 + $0x348] sm:$0xff]  ;;  %v152_v30 = vld [vmem:[%s1862_s0 + $0x378] sm:$0xff] }
  0x25   :  { %500 = vmatprep.mubr.f32.mxu1 %v18_v16  ;;  %v150_v28 = vld [vmem:[%s1862_s0 + $0x368] sm:$0xff]  ;;  %v1033_v32 = vpack.c.bf16 %v143_v26, %v139_v24  ;;  %v145_v34 = vld [vmem:[%s1862_s0 + $0x340] sm:$0xff]  ;;  %v147_v36 = vld [vmem:[%s1862_s0 + $0x350] sm:$0xff]  ;;  %v1035_v37 = vpack.c.bf16 %v152_v30, %v148_v29 }
  0x26   :  { %946 = vmatpush1.bf16.msra.mxu0 %v945_v46  ;;  %v963_v33 = vpack.c.bf16 %v150_v28, %v146_v27  ;;  %v149_v35 = vld [vmem:[%s1862_s0 + $0x360] sm:$0xff]  ;;  %v151_v38 = vld [vmem:[%s1862_s0 + $0x370] sm:$0xff]  ;;  %v154_v39 = vld [vmem:[%s1862_s0 + $0x388] sm:$0xff] }
  0x27   :  { %1018 = vmatpush1.bf16.msra.mxu1 %v1017_v47  ;;  %948 = vmatprep.subr.bf16.mxu0 %v947_v48  ;;  %v158_v40 = vld [vmem:[%s1862_s0 + $0x3a8] sm:$0xff]  ;;  %v156_v41 = vld [vmem:[%s1862_s0 + $0x398] sm:$0xff]  ;;  %v965_v43 = vpack.c.bf16 %v149_v35, %v145_v34  ;;  %v1037_v44 = vpack.c.bf16 %v151_v38, %v147_v36  ;;  %v153_v46 = vld [vmem:[%s1862_s0 + $0x380] sm:$0xff] }
  0x28   :  { %1020 = vmatprep.subr.bf16.mxu1 %v1019_v52  ;;  %v160_v42 = vld [vmem:[%s1862_s0 + $0x3b8] sm:$0xff]  ;;  %v967_v45 = vpack.c.bf16 %v158_v40, %v154_v39  ;;  %v157_v47 = vld [vmem:[%s1862_s0 + $0x3a0] sm:$0xff]  ;;  %v155_v48 = vld [vmem:[%s1862_s0 + $0x390] sm:$0xff]  ;;  %v1099_v40 = vmov 0.0  }
  0x29   :  { %v1039_v49 = vpack.c.bf16 %v160_v42, %v156_v41  ;;  %v159_v50 = vld [vmem:[%s1862_s0 + $0x3b0] sm:$0xff]  ;;  %v162_v51 = vld [vmem:[%s1862_s0 + $0x3c8] sm:$0xff]  ;;  %v164_v53 = vld [vmem:[%s1862_s0 + $0x3d8] sm:$0xff]  ;;  %v969_v55 = vpack.c.bf16 %v157_v47, %v153_v46 }
  0x2a   :  { %950 = vmatpush1.bf16.msra.mxu0 %v949_v58  ;;  %v166_v52 = vld [vmem:[%s1862_s0 + $0x3e8] sm:$0xff]  ;;  %v168_v54 = vld [vmem:[%s1862_s0 + $0x3f8] sm:$0xff]  ;;  %v1041_v56 = vpack.c.bf16 %v159_v50, %v155_v48  ;;  %v161_v58 = vld [vmem:[%s1862_s0 + $0x3c0] sm:$0xff] }
  0x2b   :  { %1022 = vmatpush1.bf16.msra.mxu1 %v1021_v59  ;;  %952 = vmatprep.subr.bf16.mxu0 %v951_v60  ;;  %v971_v57 = vpack.c.bf16 %v166_v52, %v162_v51  ;;  %v165_v59 = vld [vmem:[%s1862_s0 + $0x3e0] sm:$0xff]  ;;  %v163_v60 = vld [vmem:[%s1862_s0 + $0x3d0] sm:$0xff]  ;;  %v1043_v61 = vpack.c.bf16 %v168_v54, %v164_v53  ;;  %v170_v63 = vld [vmem:[%s1862_s0 + $0x408] sm:$0xff] }
  0x2c   :  { %1024 = vmatprep.subr.bf16.mxu1 %v1023_v0  ;;  %v167_v62 = vld [vmem:[%s1862_s0 + $0x3f0] sm:$0xff]  ;;  %v174_v0 = vld [vmem:[%s1862_s0 + $0x428] sm:$0xff]  ;;  %v172_v1 = vld [vmem:[%s1862_s0 + $0x418] sm:$0xff]  ;;  %v973_v3 = vpack.c.bf16 %v165_v59, %v161_v58 }
  0x2d   :  { %v176_v2 = vld [vmem:[%s1862_s0 + $0x438] sm:$0xff]  ;;  %v1045_v4 = vpack.c.bf16 %v167_v62, %v163_v60  ;;  %v975_v5 = vpack.c.bf16 %v174_v0, %v170_v63  ;;  %v173_v7 = vld [vmem:[%s1862_s0 + $0x420] sm:$0xff]  ;;  %v175_v10 = vld [vmem:[%s1862_s0 + $0x430] sm:$0xff] }
  0x2e   :  { %954 = vmatpush1.bf16.msra.mxu0 %v953_v6  ;;  %v169_v6 = vld [vmem:[%s1862_s0 + $0x400] sm:$0xff]  ;;  %v178_v11 = vld [vmem:[%s1862_s0 + $0x448] sm:$0xff]  ;;  %v180_v15 = vld [vmem:[%s1862_s0 + $0x458] sm:$0xff] }
  0x2f   :  { %1026 = vmatpush1.bf16.msra.mxu1 %v1025_v8  ;;  %956 = vmatprep.subr.bf16.mxu0 %v955_v9  ;;  %v1047_v8 = vpack.c.bf16 %v176_v2, %v172_v1  ;;  %v171_v9 = vld [vmem:[%s1862_s0 + $0x410] sm:$0xff]  ;;  %v182_v12 = vld [vmem:[%s1862_s0 + $0x468] sm:$0xff]  ;;  %v977_v14 = vpack.c.bf16 %v173_v7, %v169_v6  ;;  %v184_v16 = vld [vmem:[%s1862_s0 + $0x478] sm:$0xff] }
  0x30   :  { %1028 = vmatprep.subr.bf16.mxu1 %v1027_v13  ;;  %v17_v13 = vld [vmem:[%s1863_s1] sm:$0xff]  ;;  %v1049_v18 = vpack.c.bf16 %v175_v10, %v171_v9  ;;  %v1051_v22 = vpack.c.bf16 %v184_v16, %v180_v15  ;;  %v179_v23 = vld [vmem:[%s1862_s0 + $0x450] sm:$0xff]  ;;  %v24_v26 = vld [vmem:[%s1863_s1 + $0x38] sm:$0xff] }
  0x31   :  { %v21_v17 = vld [vmem:[%s1863_s1 + $0x20] sm:$0xff]  ;;  %v183_v24 = vld [vmem:[%s1862_s0 + $0x470] sm:$0xff]  ;;  %v32_v35 = vld [vmem:[%s1863_s1 + $0x78] sm:$0xff] }
  0x32   :  { %958 = vmatpush1.bf16.msra.mxu0 %v957_v19  ;;  %v979_v19 = vpack.c.bf16 %v182_v12, %v178_v11  ;;  %v1053_v28 = vpack.c.bf16 %v183_v24, %v179_v23  ;;  %v23_v29 = vld [vmem:[%s1863_s1 + $0x30] sm:$0xff]  ;;  %v33_v34 = vld [vmem:[%s1863_s1 + $0x80] sm:$0xff]  ;;  %v36_v36 = vld [vmem:[%s1863_s1 + $0x98] sm:$0xff] }
  0x33   :  { %1030 = vmatpush1.bf16.msra.mxu1 %v1029_v20  ;;  %960 = vmatprep.subr.bf16.mxu0 %v959_v21  ;;  %v177_v20 = vld [vmem:[%s1862_s0 + $0x440] sm:$0xff]  ;;  %v27_v30 = vld [vmem:[%s1863_s1 + $0x50] sm:$0xff]  ;;  %v38_v39 = vld [vmem:[%s1863_s1 + $0xa8] sm:$0xff] }
  0x34   :  { %1032 = vmatprep.subr.bf16.mxu1 %v1031_v25  ;;  %v181_v21 = vld [vmem:[%s1862_s0 + $0x460] sm:$0xff]  ;;  %v20_v25 = vld [vmem:[%s1863_s1 + $0x18] sm:$0xff]  ;;  %v39_v38 = vld [vmem:[%s1863_s1 + $0xb0] sm:$0xff] }
  0x35   :  { %v981_v27 = vpack.c.bf16 %v181_v21, %v177_v20  ;;  %v19_v41 = vld [vmem:[%s1863_s1 + $0x10] sm:$0xff]  ;;  %v22_v42 = vld [vmem:[%s1863_s1 + $0x28] sm:$0xff]  ;;  %v37_v47 = vld [vmem:[%s1863_s1 + $0xa0] sm:$0xff] }
  0x36   :  { %962 = vmatpush1.bf16.msra.mxu0 %v961_v31  ;;  %v26_v31 = vld [vmem:[%s1863_s1 + $0x48] sm:$0xff]  ;;  %v40_v48 = vld [vmem:[%s1863_s1 + $0xb8] sm:$0xff] }
  0x37   :  { %1034 = vmatpush1.bf16.msra.mxu1 %v1033_v32  ;;  %964 = vmatprep.subr.bf16.mxu0 %v963_v33  ;;  %v30_v32 = vld [vmem:[%s1863_s1 + $0x68] sm:$0xff]  ;;  %v29_v33 = vld [vmem:[%s1863_s1 + $0x60] sm:$0xff] }
  0x38   :  { %1036 = vmatprep.subr.bf16.mxu1 %v1035_v37  ;;  %v35_v37 = vld [vmem:[%s1863_s1 + $0x90] sm:$0xff]  ;;  %v34_v46 = vld [vmem:[%s1863_s1 + $0x88] sm:$0xff] }
  0x3a   :  { %966 = vmatpush1.bf16.msra.mxu0 %v965_v43  ;;  %v25_v43 = vld [vmem:[%s1863_s1 + $0x40] sm:$0xff] }
  0x3b   :  { %1038 = vmatpush1.bf16.msra.mxu1 %v1037_v44  ;;  %968 = vmatprep.subr.bf16.mxu0 %v967_v45  ;;  %v28_v44 = vld [vmem:[%s1863_s1 + $0x58] sm:$0xff]  ;;  %v31_v45 = vld [vmem:[%s1863_s1 + $0x70] sm:$0xff] }
  0x3c   :  { %1040 = vmatprep.subr.bf16.mxu1 %v1039_v49 }
  0x3e   :  { %970 = vmatpush1.bf16.msra.mxu0 %v969_v55 }
  0x3f   :  { %1042 = vmatpush1.bf16.msra.mxu1 %v1041_v56  ;;  %972 = vmatprep.subr.bf16.mxu0 %v971_v57 }
  0x40   :  { %1044 = vmatprep.subr.bf16.mxu1 %v1043_v61 }
  0x42   :  { %974 = vmatpush1.bf16.msra.mxu0 %v973_v3 }
  0x43   :  { %1046 = vmatpush1.bf16.msra.mxu1 %v1045_v4  ;;  %976 = vmatprep.subr.bf16.mxu0 %v975_v5 }
  0x44   :  { %1048 = vmatprep.subr.bf16.mxu1 %v1047_v8 }
  0x45   :  { %275 = vmatmul.mubr.f32.vlgmr.msra.gmra.mrb[0].mxu0 %v17_v13 }
  0x46   :  { %501 = vmatmul.mubr.f32.vlgmr.msra.gmra.mrb[0].mxu1 %v17_v13  ;;  %978 = vmatpush1.bf16.msra.mxu0 %v977_v14 }
  0x47   :  { %280 = vmatprep.mubr.f32.mxu0 %v21_v17  ;;  %506 = vmatprep.mubr.f32.mxu1 %v21_v17 }
  0x48   :  { %1050 = vmatpush1.bf16.msra.mxu1 %v1049_v18  ;;  %980 = vmatprep.subr.bf16.mxu0 %v979_v19 }
  0x49   :  { %281 = vmatmul.mubr.f32.gmra.mrb[2].mxu0 %v20_v25  ;;  %1052 = vmatprep.subr.bf16.mxu1 %v1051_v22 }
  0x4a   :  { %507 = vmatmul.mubr.f32.gmra.mrb[2].mxu1 %v20_v25  ;;  %286 = vmatprep.mubr.f32.mxu0 %v24_v26 }
  0x4b   :  { %512 = vmatprep.mubr.f32.mxu1 %v24_v26  ;;  %982 = vmatpush1.bf16.msra.mxu0 %v981_v27 }
  0x4c   :  { %1054 = vmatpush1.bf16.msra.mxu1 %v1053_v28 }
  0x4d   :  { %287 = vmatmul.mubr.f32.gmra.mrb[4].mxu0 %v23_v29 }
  0x4e   :  { %513 = vmatmul.mubr.f32.gmra.mrb[4].mxu1 %v23_v29  ;;  %292 = vmatprep.mubr.f32.mxu0 %v27_v30 }
  0x4f   :  { %518 = vmatprep.mubr.f32.mxu1 %v27_v30 }
  0x51   :  { %293 = vmatmul.mubr.f32.gmra.mrb[6].mxu0 %v26_v31 }
  0x52   :  { %519 = vmatmul.mubr.f32.gmra.mrb[6].mxu1 %v26_v31  ;;  %298 = vmatprep.mubr.f32.mxu0 %v30_v32 }
  0x53   :  { %524 = vmatprep.mubr.f32.mxu1 %v30_v32 }
  0x55   :  { %299 = vmatmul.mubr.f32.gmra.mrb[8].mxu0 %v29_v33 }
  0x56   :  { %525 = vmatmul.mubr.f32.gmra.mrb[8].mxu1 %v29_v33  ;;  %304 = vmatprep.mubr.f32.mxu0 %v33_v34 }
  0x57   :  { %530 = vmatprep.mubr.f32.mxu1 %v33_v34 }
  0x59   :  { %305 = vmatmul.mubr.f32.gmra.mrb[10].mxu0 %v32_v35 }
  0x5a   :  { %531 = vmatmul.mubr.f32.gmra.mrb[10].mxu1 %v32_v35  ;;  %310 = vmatprep.mubr.f32.mxu0 %v36_v36 }
  0x5b   :  { %536 = vmatprep.mubr.f32.mxu1 %v36_v36 }
  0x5d   :  { %311 = vmatmul.mubr.f32.gmra.mrb[12].mxu0 %v35_v37 }
  0x5e   :  { %537 = vmatmul.mubr.f32.gmra.mrb[12].mxu1 %v35_v37  ;;  %316 = vmatprep.mubr.f32.mxu0 %v39_v38 }
  0x5f   :  { %542 = vmatprep.mubr.f32.mxu1 %v39_v38 }
  0x61   :  { %317 = vmatmul.mubr.f32.gmra.mrb[14].mxu0 %v38_v39 }
  0x62   :  { %543 = vmatmul.mubr.f32.gmra.mrb[14].mxu1 %v38_v39  ;;  %387 = vmatprep.mubr.f32.mxu0 %v1099_v40 }
  0x63   :  { %613 = vmatprep.mubr.f32.mxu1 %v1099_v40 }
  0x65   :  { %887 = vmatmul.mubr.msk.f32.vlgmr.msra.gmra.mrb[0].mxu0 %vm185_vm0, %v19_v41 }
  0x66   :  { %895 = vmatmul.mubr.msk.f32.vlgmr.msra.gmra.mrb[0].mxu1 %vm185_vm0, %v19_v41  ;;  %393 = vmatprep.mubr.f32.mxu0 %v1099_v40 }
  0x67   :  { %619 = vmatprep.mubr.f32.mxu1 %v1099_v40 }
  0x69   :  { %888 = vmatmul.mubr.msk.f32.gmra.mrb[2].mxu0 %vm185_vm0, %v22_v42 }
  0x6a   :  { %896 = vmatmul.mubr.msk.f32.gmra.mrb[2].mxu1 %vm185_vm0, %v22_v42  ;;  %399 = vmatprep.mubr.f32.mxu0 %v1099_v40 }
  0x6b   :  { %625 = vmatprep.mubr.f32.mxu1 %v1099_v40 }
  0x6d   :  { %889 = vmatmul.mubr.msk.f32.gmra.mrb[4].mxu0 %vm185_vm0, %v25_v43 }
  0x6e   :  { %897 = vmatmul.mubr.msk.f32.gmra.mrb[4].mxu1 %vm185_vm0, %v25_v43  ;;  %405 = vmatprep.mubr.f32.mxu0 %v1099_v40 }
  0x6f   :  { %631 = vmatprep.mubr.f32.mxu1 %v1099_v40 }
  0x71   :  { %890 = vmatmul.mubr.msk.f32.gmra.mrb[6].mxu0 %vm185_vm0, %v28_v44 }
  0x72   :  { %898 = vmatmul.mubr.msk.f32.gmra.mrb[6].mxu1 %vm185_vm0, %v28_v44  ;;  %411 = vmatprep.mubr.f32.mxu0 %v1099_v40 }
  0x73   :  { %637 = vmatprep.mubr.f32.mxu1 %v1099_v40 }
  0x75   :  { %891 = vmatmul.mubr.msk.f32.gmra.mrb[8].mxu0 %vm185_vm0, %v31_v45 }
  0x76   :  { %899 = vmatmul.mubr.msk.f32.gmra.mrb[8].mxu1 %vm185_vm0, %v31_v45  ;;  %417 = vmatprep.mubr.f32.mxu0 %v1099_v40 }
  0x77   :  { %643 = vmatprep.mubr.f32.mxu1 %v1099_v40 }
  0x79   :  { %892 = vmatmul.mubr.msk.f32.gmra.mrb[10].mxu0 %vm185_vm0, %v34_v46 }
  0x7a   :  { %900 = vmatmul.mubr.msk.f32.gmra.mrb[10].mxu1 %vm185_vm0, %v34_v46  ;;  %423 = vmatprep.mubr.f32.mxu0 %v1099_v40 }
  0x7b   :  { %649 = vmatprep.mubr.f32.mxu1 %v1099_v40 }
  0x7d   :  { %893 = vmatmul.mubr.msk.f32.gmra.mrb[12].mxu0 %vm185_vm0, %v37_v47 }
  0x7e   :  { %901 = vmatmul.mubr.msk.f32.gmra.mrb[12].mxu1 %vm185_vm0, %v37_v47  ;;  %429 = vmatprep.mubr.f32.mxu0 %v1099_v40 }
  0x7f   :  { %655 = vmatprep.mubr.f32.mxu1 %v1099_v40 }
  0x81   :  { %894 = vmatmul.mubr.msk.f32.gmra.mrb[14].mxu0 %vm185_vm0, %v40_v48 }
  0x82   :  { %902 = vmatmul.mubr.msk.f32.gmra.mrb[14].mxu1 %vm185_vm0, %v40_v48 }
 0x138   :  { %v1646_v49 = vpop.f32.mrb[0].mxu0 }
 0x139   :  { %v682_v50 = vmul.f32 %v1646_v49, %v1646_v49  ;;  %v1650_v51 = vpop.f32.mrb[0].mxu1  ;;  %v1652_v52 = vpop.f32.mrb[1].mxu0 }
 0x13a   :  { %v662_v53 = vadd.f32 %v1652_v52, %v1646_v49  ;;  %v683_v54 = vmul.f32 %v1652_v52, %v1652_v52  ;;  %v1658_v55 = vpop.f32.mrb[1].mxu1  ;;  %v684_v59 = vmul.f32 %v1650_v51, %v1650_v51 }
 0x13b   :  { %v685_v3 = vmul.f32 %v1658_v55, %v1658_v55 }
 0x13c   :  { %v1660_v56 = vpop.f32.mrb[2].mxu0  ;;  %v663_v57 = vadd.f32 %v662_v53, %v1650_v51  ;;  %v698_v58 = vadd.f32 %v683_v54, %v682_v50 }
 0x13d   :  { %v686_v60 = vmul.f32 %v1660_v56, %v1660_v56  ;;  %v1667_v61 = vpop.f32.mrb[2].mxu1  ;;  %v1669_v62 = vpop.f32.mrb[3].mxu0 }
 0x13e   :  { %v667_v63 = vadd.f32 %v1669_v62, %v1660_v56  ;;  %v687_v0 = vmul.f32 %v1669_v62, %v1669_v62  ;;  %v1675_v1 = vpop.f32.mrb[3].mxu1  ;;  %v664_v2 = vadd.f32 %v663_v57, %v1658_v55  ;;  %v699_v4 = vadd.f32 %v698_v58, %v684_v59 }
 0x13f   :  { %v688_v5 = vmul.f32 %v1667_v61, %v1667_v61  ;;  %v689_v16 = vmul.f32 %v1675_v1, %v1675_v1 }
 0x140   :  { %665 = vadd.xlane.f32.xlu0 %v664_v2  ;;  %v1682_v6 = vpop.f32.mrb[4].mxu0  ;;  %v703_v7 = vadd.f32 %v687_v0, %v686_v60  ;;  %v668_v8 = vadd.f32 %v667_v63, %v1667_v61  ;;  %v700_v12 = vadd.f32 %v699_v4, %v685_v3  ;;  %v1100_v0 = vmov 0  }
 0x141   :  { %v1685_v9 = vpop.f32.mrb[4].mxu1  ;;  %v690_v10 = vmul.f32 %v1682_v6, %v1682_v6  ;;  %v1689_v11 = vpop.f32.mrb[5].mxu0  ;;  %1089 = vset.pattern.permute.xlu0 %v1100_v0  ;;  %1090 = vset.pattern.permute.xlu1 %v1100_v0 }
 0x142   :  { %v672_v13 = vadd.f32 %v1689_v11, %v1682_v6  ;;  %v691_v14 = vmul.f32 %v1689_v11, %v1689_v11  ;;  %v1695_v15 = vpop.f32.mrb[5].mxu1  ;;  %v704_v17 = vadd.f32 %v703_v7, %v688_v5  ;;  %v669_v18 = vadd.f32 %v668_v8, %v1675_v1 }
 0x143   :  { %v692_v23 = vmul.f32 %v1685_v9, %v1685_v9  ;;  %v693_v31 = vmul.f32 %v1695_v15, %v1695_v15 }
 0x144   :  { %701 = vadd.xlane.f32.xlu0 %v700_v12  ;;  %v1700_v19 = vpop.f32.mrb[6].mxu0  ;;  %v705_v20 = vadd.f32 %v704_v17, %v689_v16  ;;  %v673_v21 = vadd.f32 %v672_v13, %v1685_v9  ;;  %v708_v22 = vadd.f32 %v691_v14, %v690_v10 }
 0x145   :  { %v1705_v24 = vpop.f32.mrb[6].mxu1  ;;  %v694_v25 = vmul.f32 %v1700_v19, %v1700_v19  ;;  %v1709_v26 = vpop.f32.mrb[7].mxu0 }
 0x146   :  { %v677_v27 = vadd.f32 %v1709_v26, %v1700_v19  ;;  %v695_v28 = vmul.f32 %v1709_v26, %v1709_v26  ;;  %v1715_v29 = vpop.f32.mrb[7].mxu1  ;;  %706 = vadd.xlane.f32.xlu1 %v705_v20  ;;  %v674_v30 = vadd.f32 %v673_v21, %v1695_v15  ;;  %v709_v32 = vadd.f32 %v708_v22, %v692_v23 }
 0x147   :  { %v696_v33 = vmul.f32 %v1705_v24, %v1705_v24  ;;  %v697_v42 = vmul.f32 %v1715_v29, %v1715_v29 }
 0x148   :  { %670 = vadd.xlane.f32.xlu0 %v669_v18  ;;  %v1722_v34 = vpop.f32.mrb[8].mxu0  ;;  %v678_v35 = vadd.f32 %v677_v27, %v1705_v24  ;;  %v713_v36 = vadd.f32 %v695_v28, %v694_v25  ;;  %v710_v39 = vadd.f32 %v709_v32, %v693_v31 }
 0x149   :  { %v1725_v37 = vpop.f32.mrb[8].mxu1  ;;  %v1727_v38 = vpop.f32.mrb[9].mxu0 }
 0x14a   :  { %v1729_v40 = vpop.f32.mrb[9].mxu1  ;;  %675 = vadd.xlane.f32.xlu1 %v674_v30  ;;  %v679_v41 = vadd.f32 %v678_v35, %v1715_v29  ;;  %v714_v43 = vadd.f32 %v713_v36, %v696_v33  ;;  %v734_v36 = vld [vmem:[%s1864_s2] sm:$0xff] }
 0x14c   :  { %711 = vadd.xlane.f32.xlu0 %v710_v39  ;;  %v1734_v44 = vpop.f32.mrb[10].mxu0  ;;  %v715_v45 = vadd.f32 %v714_v43, %v697_v42 }
 0x14d   :  { %v1736_v46 = vpop.f32.mrb[10].mxu1  ;;  %v1738_v47 = vpop.f32.mrb[11].mxu0 }
 0x14e   :  { %v1740_v48 = vpop.f32.mrb[11].mxu1  ;;  %680 = vadd.xlane.f32.xlu1 %v679_v41 }
 0x150   :  { %v1742_v50 = vpop.f32.mrb[12].mxu0 }
 0x151   :  { %v1744_v53 = vpop.f32.mrb[12].mxu1  ;;  %v1746_v54 = vpop.f32.mrb[13].mxu0 }
 0x152   :  { %v1748_v57 = vpop.f32.mrb[13].mxu1  ;;  %716 = vadd.xlane.f32.xlu1 %v715_v45  ;;  %v735_v45 = vld [vmem:[%s1864_s2 + $0x8] sm:$0xff] }
 0x154   :  { %v1750_v58 = vpop.f32.mrb[14].mxu0 }
 0x155   :  { %v1752_v59 = vpop.f32.mrb[14].mxu1  ;;  %v1754_v60 = vpop.f32.mrb[15].mxu0 }
 0x156   :  { %v1756_v63 = vpop.f32.mrb[15].mxu1 }
 0x1cd   :  { %v666_v2 = vpop.xlane.xlu0 %665 }
 0x1ce   :  { %v718_v3 = vmul.f32 0.001953125, %v666_v2 }
 0x1d0   :  { %v726_v5 = vmul.f32 %v718_v3, %v718_v3 }
 0x1d1   :  { %v702_v4 = vpop.xlane.xlu0 %701 }
 0x1d2   :  { %v722_v7 = vmul.f32 0.001953125, %v702_v4 }
 0x1d3   :  { %v707_v8 = vpop.xlane.xlu1 %706 }
 0x1d4   :  { %v730_v10 = vsub.f32 %v722_v7, %v726_v5  ;;  %v723_v17 = vmul.f32 0.001953125, %v707_v8  ;;  %v750_v7 = vld [vmem:[%s1865_s3] sm:$0xff] }
 0x1d5   :  { %v671_v12 = vpop.xlane.xlu0 %670 }
 0x1d6   :  { %v738_v13 = vadd.f32 1e-05, %v730_v10  ;;  %v719_v14 = vmul.f32 0.001953125, %v671_v12  ;;  %v736_v12 = vld [vmem:[%s1864_s2 + $0x10] sm:$0xff] }
 0x1d7   :  { %v676_v16 = vpop.xlane.xlu1 %675 }
 0x1d8   :  { %1091 = vrsqrt.f32 %v738_v13  ;;  %v727_v18 = vmul.f32 %v719_v14, %v719_v14  ;;  %v720_v20 = vmul.f32 0.001953125, %v676_v16 }
 0x1d9   :  { %v712_v21 = vpop.xlane.xlu0 %711 }
 0x1da   :  { %v731_v22 = vsub.f32 %v723_v17, %v727_v18  ;;  %v728_v23 = vmul.f32 %v720_v20, %v720_v20  ;;  %v724_v25 = vmul.f32 0.001953125, %v712_v21  ;;  %v751_v17 = vld [vmem:[%s1865_s3 + $0x8] sm:$0xff]  ;;  %v737_v21 = vld [vmem:[%s1864_s2 + $0x18] sm:$0xff] }
 0x1db   :  { %v681_v27 = vpop.xlane.xlu1 %680 }
 0x1dc   :  { %v739_v28 = vadd.f32 1e-05, %v731_v22  ;;  %v732_v30 = vsub.f32 %v724_v25, %v728_v23  ;;  %v721_v31 = vmul.f32 0.001953125, %v681_v27  ;;  %v752_v25 = vld [vmem:[%s1865_s3 + $0x10] sm:$0xff] }
 0x1de   :  { %1093 = vrsqrt.f32 %v739_v28  ;;  %v740_v33 = vadd.f32 1e-05, %v732_v30  ;;  %v729_v41 = vmul.f32 %v721_v31, %v721_v31  ;;  %v753_v28 = vld [vmem:[%s1865_s3 + $0x18] sm:$0xff] }
 0x1df   :  { %v717_v32 = vpop.xlane.xlu1 %716 }
 0x1e0   :  { %v725_v35 = vmul.f32 0.001953125, %v717_v32  ;;  %1095 = vrsqrt.f32 %v740_v33 }
 0x1e2   :  { %v1092_v39 = vpop.eup %1091  ;;  %v733_v43 = vsub.f32 %v725_v35, %v729_v41 }
 0x1e3   :  { %v746_v42 = vmul.f32 %v1092_v39, %v734_v36 }
 0x1e4   :  { %v741_v2 = vadd.f32 1e-05, %v733_v43 }
 0x1e5   :  { %764 = vperm.xlu0 %1089, %v746_v42   ;;  %v754_v5 = vmul.f32 %v746_v42, %v718_v3 }
 0x1e6   :  { %1097 = vrsqrt.f32 %v741_v2 }
 0x1e7   :  { %v758_v8 = vsub.f32 %v750_v7, %v754_v5 }
 0x1e8   :  { %v1094_v0 = vpop.eup %1093 }
 0x1e9   :  { %v747_v4 = vmul.f32 %v1094_v0, %v735_v45 }
 0x1ea   :  { %v1096_v10 = vpop.eup %1095 }
 0x1eb   :  { %769 = vperm.xlu1 %1090, %v747_v4   ;;  %v755_v13 = vmul.f32 %v747_v4, %v719_v14  ;;  %v748_v16 = vmul.f32 %v1096_v10, %v736_v12 }
 0x1ed   :  { %v759_v3 = vsub.f32 %v751_v17, %v755_v13  ;;  %v756_v23 = vmul.f32 %v748_v16, %v720_v20 }
 0x1ef   :  { %800 = vperm.xlu1 %1090, %v758_v8   ;;  %v760_v14 = vsub.f32 %v752_v25, %v756_v23 }
 0x1f0   :  { %v1098_v18 = vpop.eup %1097 }
 0x1f1   :  { %v749_v22 = vmul.f32 %v1098_v18, %v737_v21 }
 0x1f3   :  { %774 = vperm.xlu1 %1090, %v748_v16   ;;  %v757_v27 = vmul.f32 %v749_v22, %v721_v31 }
 0x1f5   :  { %v761_v30 = vsub.f32 %v753_v28, %v757_v27 }
 0x1f7   :  { %805 = vperm.xlu1 %1090, %v759_v3  }
 0x1fb   :  { %779 = vperm.xlu1 %1090, %v749_v22  }
 0x1ff   :  { %810 = vperm.xlu1 %1090, %v760_v14  }
 0x203   :  { %815 = vperm.xlu1 %1090, %v761_v30  }
 0x264   :  { %v765_v32 = vpop.permute.xlu0 %764 }
 0x265   :  { %v782_v35 = vmul.f32 %v765_v32, %v1646_v49  ;;  %v783_v20 = vmul.f32 %v765_v32, %v1652_v52  ;;  %v784_v36 = vmul.f32 %v765_v32, %v1650_v51  ;;  %v785_v39 = vmul.f32 %v765_v32, %v1658_v55 }
 0x26a   :  { %v770_v33 = vpop.permute.xlu1 %769 }
 0x26b   :  { %v786_v55 = vmul.f32 %v770_v33, %v1660_v56  ;;  %v787_v10 = vmul.f32 %v770_v33, %v1669_v62  ;;  %v788_v12 = vmul.f32 %v770_v33, %v1667_v61  ;;  %v789_v13 = vmul.f32 %v770_v33, %v1675_v1 }
 0x26e   :  { %v801_v41 = vpop.permute.xlu1 %800 }
 0x26f   :  { %v818_v42 = vadd.f32 %v801_v41, %v782_v35  ;;  %v819_v31 = vadd.f32 %v801_v41, %v783_v20  ;;  %v820_v43 = vadd.f32 %v801_v41, %v784_v36  ;;  %v821_v45 = vadd.f32 %v801_v41, %v785_v39 }
 0x271   :  { %v834_v0 = vmax.f32 %v818_v42, 0.0  ;;  %v835_v2 = vmax.f32 %v819_v31, 0.0  ;;  %v836_v4 = vmax.f32 %v820_v43, 0.0  ;;  %v837_v5 = vmax.f32 %v821_v45, 0.0 }
 0x272   :  { %v775_v7 = vpop.permute.xlu1 %774 }
 0x273   :  { %v850_v8 = vadd.f32 %v834_v0, %v1722_v34  ;;  %v851_v49 = vadd.f32 %v835_v2, %v1727_v38  ;;  %v852_v52 = vadd.f32 %v836_v4, %v1725_v37  ;;  %v853_v51 = vadd.f32 %v837_v5, %v1729_v40 }
 0x274   :  { %v790_v23 = vmul.f32 %v775_v7, %v1682_v6  ;;  %v791_v25 = vmul.f32 %v775_v7, %v1689_v11  ;;  %v792_v14 = vmul.f32 %v775_v7, %v1685_v9  ;;  %v793_v27 = vmul.f32 %v775_v7, %v1695_v15 }
 0x275   :  { %866 = vst [vmem:[%s1866_s4] sm:$0xff] %v850_v8  ;;  %867 = vst [vmem:[%s1866_s4 + $0x8] sm:$0xff] %v851_v49 }
 0x276   :  { %903 = vst [vmem:[%s1866_s4 + $0x40] sm:$0xff] %v852_v52  ;;  %904 = vst [vmem:[%s1866_s4 + $0x48] sm:$0xff] %v853_v51  ;;  %v806_v56 = vpop.permute.xlu1 %805 }
 0x277   :  { %v822_v61 = vadd.f32 %v806_v56, %v786_v55  ;;  %v823_v62 = vadd.f32 %v806_v56, %v787_v10  ;;  %v824_v1 = vadd.f32 %v806_v56, %v788_v12  ;;  %v825_v34 = vadd.f32 %v806_v56, %v789_v13 }
 0x279   :  { %v838_v37 = vmax.f32 %v822_v61, 0.0  ;;  %v839_v38 = vmax.f32 %v823_v62, 0.0  ;;  %v840_v40 = vmax.f32 %v824_v1, 0.0  ;;  %v841_v16 = vmax.f32 %v825_v34, 0.0 }
 0x27a   :  { %v780_v17 = vpop.permute.xlu1 %779 }
 0x27b   :  { %v854_v3 = vadd.f32 %v838_v37, %v1734_v44  ;;  %v855_v18 = vadd.f32 %v839_v38, %v1738_v47  ;;  %v856_v21 = vadd.f32 %v840_v40, %v1736_v46  ;;  %v857_v22 = vadd.f32 %v841_v16, %v1740_v48 }
 0x27c   :  { %v794_v30 = vmul.f32 %v780_v17, %v1700_v19  ;;  %v795_v32 = vmul.f32 %v780_v17, %v1709_v26  ;;  %v796_v33 = vmul.f32 %v780_v17, %v1705_v24  ;;  %v797_v35 = vmul.f32 %v780_v17, %v1715_v29 }
 0x27d   :  { %868 = vst [vmem:[%s1866_s4 + $0x10] sm:$0xff] %v854_v3  ;;  %869 = vst [vmem:[%s1866_s4 + $0x18] sm:$0xff] %v855_v18 }
 0x27e   :  { %905 = vst [vmem:[%s1866_s4 + $0x50] sm:$0xff] %v856_v21  ;;  %906 = vst [vmem:[%s1866_s4 + $0x58] sm:$0xff] %v857_v22  ;;  %v811_v6 = vpop.permute.xlu1 %810 }
 0x27f   :  { %v826_v9 = vadd.f32 %v811_v6, %v790_v23  ;;  %v827_v11 = vadd.f32 %v811_v6, %v791_v25  ;;  %v828_v15 = vadd.f32 %v811_v6, %v792_v14  ;;  %v829_v44 = vadd.f32 %v811_v6, %v793_v27 }
 0x281   :  { %v842_v46 = vmax.f32 %v826_v9, 0.0  ;;  %v843_v47 = vmax.f32 %v827_v11, 0.0  ;;  %v844_v48 = vmax.f32 %v828_v15, 0.0  ;;  %v845_v28 = vmax.f32 %v829_v44, 0.0 }
 0x282   :  { %v816_v20 = vpop.permute.xlu1 %815 }
 0x283   :  { %v858_v36 = vadd.f32 %v842_v46, %v1742_v50  ;;  %v859_v39 = vadd.f32 %v843_v47, %v1746_v54  ;;  %v860_v41 = vadd.f32 %v844_v48, %v1744_v53  ;;  %v861_v42 = vadd.f32 %v845_v28, %v1748_v57 }
 0x284   :  { %v830_v31 = vadd.f32 %v816_v20, %v794_v30  ;;  %v831_v43 = vadd.f32 %v816_v20, %v795_v32  ;;  %v832_v45 = vadd.f32 %v816_v20, %v796_v33  ;;  %v833_v0 = vadd.f32 %v816_v20, %v797_v35 }
 0x285   :  { %870 = vst [vmem:[%s1866_s4 + $0x20] sm:$0xff] %v858_v36  ;;  %871 = vst [vmem:[%s1866_s4 + $0x28] sm:$0xff] %v859_v39 }
 0x286   :  { %907 = vst [vmem:[%s1866_s4 + $0x60] sm:$0xff] %v860_v41  ;;  %908 = vst [vmem:[%s1866_s4 + $0x68] sm:$0xff] %v861_v42  ;;  %v846_v19 = vmax.f32 %v830_v31, 0.0  ;;  %v847_v24 = vmax.f32 %v831_v43, 0.0  ;;  %v848_v26 = vmax.f32 %v832_v45, 0.0  ;;  %v849_v29 = vmax.f32 %v833_v0, 0.0 }
 0x288   :  { %v862_v50 = vadd.f32 %v846_v19, %v1750_v58  ;;  %v863_v53 = vadd.f32 %v847_v24, %v1754_v60  ;;  %v864_v54 = vadd.f32 %v848_v26, %v1752_v59  ;;  %v865_v57 = vadd.f32 %v849_v29, %v1756_v63 }
 0x28a   :  { %872 = vst [vmem:[%s1866_s4 + $0x30] sm:$0xff] %v862_v50  ;;  %873 = vst [vmem:[%s1866_s4 + $0x38] sm:$0xff] %v863_v53 }
 0x28b   :  { %909 = vst [vmem:[%s1866_s4 + $0x70] sm:$0xff] %v864_v54  ;;  %910 = vst [vmem:[%s1866_s4 + $0x78] sm:$0xff] %v865_v57 }

</bundles_post_ra>
